<compile_context>
chip_gen: v7x
topology: tpu7x:2x2x1
jax: 0.10.0
libtpu: 0.0.40
codegen_flags: <defaults>
</compile_context>

<pallas_src>
import functools

import jax
import jax.numpy as jnp
from jax.experimental import pallas as pl
from jax.experimental.pallas import tpu as pltpu


def contrastive_rp_kernel(x1_ref, x2_ref, we_ref, wc_ref, bc_ref, o_ref):
    # VPU: difference of the two views in f32 (the embedder bias cancels exactly).
    dx = x1_ref[...].astype(jnp.float32) - x2_ref[...].astype(jnp.float32)  # (TB, D)

    # MXU: single matmul, computed transposed so the batch lands on lanes:
    #   (z1 - z2)^T = W_emb @ (x1 - x2)^T  -> (E, TB), f32 accumulation.
    # f32 operands: kernel is HBM-bound, so the extra MXU passes are hidden under
    # the input DMA.  (precision=HIGHEST could be added for guaranteed 6-pass f32.)
    zd_t = jax.lax.dot_general(
        we_ref[...],                                   # (E, D) f32, resident
        dx,                                            # (TB, D) f32
        dimension_numbers=(((1,), (1,)), ((), ())),    # contract D  (A @ B^T)
        preferred_element_type=jnp.float32,
    )                                                  # (E, TB) f32

    # Classifier Linear(E, 1): VPU |.| * w_clf^T, then sublane (E-axis) reduction.
    # Result is a lane-dense (1, TB) row -> unmasked vector store.
    s = jnp.sum(jnp.abs(zd_t) * wc_ref[...], axis=0, keepdims=True)   # (1, TB)
    o_ref[...] = (s + bc_ref[0, 0]).astype(o_ref.dtype)


def _round_up(x, m):
    return ((x + m - 1) // m) * m


@functools.partial(jax.jit, static_argnames=("tb",))
def contrastive_rp_net(x1, x2, w_emb, b_emb, w_clf, b_clf, *, tb=512):
    """x1, x2: (B, D).  w_emb: (E, D), b_emb: (E,)   [PyTorch Linear(D, E)].
    w_clf: (1, E), b_clf: (1,)                       [PyTorch Linear(E, 1)].
    Returns (B, 1) float32.

    b_emb is accepted for interface fidelity but never used: it cancels exactly in
    z1 - z2.  `tb` is the batch tile (kept a multiple of 128); the HBM-bound
    roofline wants it >= 512 for realistic batch sizes, and it is clamped to the
    128-padded batch so tiny batches don't over-pad.
    """
    B, D = x1.shape
    E = w_emb.shape[0]
    del b_emb  # cancels in z1 - z2

    # ---- batch tiling -------------------------------------------------------
    tb = max(128, min(tb, _round_up(B, 128)))          # multiple of 128, <= padded B
    n_tiles = pl.cdiv(B, tb)
    b_pad = n_tiles * tb
    if b_pad != B:
        pad = ((0, b_pad - B), (0, 0))
        x1 = jnp.pad(x1, pad)
        x2 = jnp.pad(x2, pad)

    # ---- parameters (native PyTorch layouts, f32 MXU operands) --------------
    we = w_emb.astype(jnp.float32)                        # (E, D) resident
    wc = jnp.transpose(w_clf).astype(jnp.float32)         # (E, 1) resident
    bc = jnp.reshape(b_clf, (1, 1)).astype(jnp.float32)   # scalar -> SMEM

    # ---- resident weights: single-buffer when large -------------------------
    # A constant index_map only fetches the block once, but the pipeline still
    # allocates 2 buffers by default; for large E*D the second copy is pure VMEM
    # waste (critical on v7x's 64 MiB).  Small weights keep the default (cheapest,
    # most battle-tested) path.
    w_bytes = E * D * we.dtype.itemsize
    if w_bytes > (2 << 20):
        w_kwargs = dict(pipeline_mode=pl.Buffered(1))
        w_copies = 1
    else:
        w_kwargs = {}
        w_copies = 2
    # TODO(synk): if E*D (plus x-tile double buffers) outgrows v7x's 64 MiB VMEM,
    # add a D-reduction grid axis ("arbitrary") with an f32 accumulator instead of
    # shrinking tb.

    # ---- per-generation VMEM budget ------------------------------------------
    x_bytes = x1.dtype.itemsize
    need = (
        2 * 2 * tb * D * x_bytes           # x1, x2: double-buffered input tiles
        + w_copies * (w_bytes + E * 4)     # resident W_emb + W_clf^T
        + 2 * tb * 4                       # double-buffered output row
    )
    try:
        # 128 MiB on v5e/v6e, 64 MiB on v7x.
        phys_vmem = pltpu.get_tpu_info().vmem_capacity_bytes
    except Exception:
        phys_vmem = 64 * 1024 * 1024       # assume the smallest (v7x)
    # Raise the scoped limit above the default (16 MiB on v5e, 32 MiB elsewhere) so
    # large batch tiles fit, but leave >=15% of physical VMEM as headroom for
    # Mosaic internal scratch/semaphores (never pin v7x at its full 64 MiB).
    vmem_limit = int(min(need * 1.25 + (2 << 20), phys_vmem * 0.85))
    vmem_limit = max(vmem_limit, 16 << 20)

    out = pl.pallas_call(
        contrastive_rp_kernel,
        grid=(n_tiles,),
        in_specs=[
            pl.BlockSpec((tb, D), lambda i: (i, 0)),              # x1 tile (pipelined)
            pl.BlockSpec((tb, D), lambda i: (i, 0)),              # x2 tile (pipelined)
            pl.BlockSpec((E, D), lambda i: (0, 0), **w_kwargs),   # W_emb  (resident)
            pl.BlockSpec((E, 1), lambda i: (0, 0), **w_kwargs),   # W_clf^T (resident)
            pl.BlockSpec(memory_space=pltpu.MemorySpace.SMEM),    # b_clf scalar
        ],
        out_specs=pl.BlockSpec((1, tb), lambda i: (0, i)),        # lane-dense row
        out_shape=jax.ShapeDtypeStruct((1, b_pad), jnp.float32),
        compiler_params=pltpu.CompilerParams(
            # "parallel" shards batch tiles across both v7x TensorCores (no-op on
            # single-TC v5e/v6e).  Switch to (pltpu.CORE_PARALLEL,) if profiling
            # shows one v7x core idle.
            dimension_semantics=("parallel",),
            vmem_limit_bytes=vmem_limit,
        ),
        cost_estimate=pl.CostEstimate(
            flops=2 * B * D * E + 3 * B * E,
            bytes_accessed=2 * B * D * x_bytes + w_bytes + E * 4 + B * 4,
            transcendentals=0,
        ),
    )(x1, x2, we, wc, bc)

    # (1, b_pad) -> (B, 1): wrapper-side layout plumbing, essentially free.
    return out.reshape(b_pad, 1)[:B]


def reference(x1, x2, w_emb, b_emb, w_clf, b_clf):
    # Faithful f32 module forward (bias included in both embeddings).
    z1 = x1 @ w_emb.T + b_emb
    z2 = x2 @ w_emb.T + b_emb
    return jnp.abs(z1 - z2) @ w_clf.T + b_clf


if __name__ == "__main__":
    # Small but MXU-shaped demo: D = E = 128 fill a full MXU tile; B = 1024 gives
    # two tb=512 grid steps (exercises the software pipeline / both v7x TCs).
    B, D, E = 1024, 128, 128

    key = jax.random.PRNGKey(0)
    k1, k2, k3, k4, k5, k6 = jax.random.split(key, 6)

    x1 = jax.random.normal(k1, (B, D), dtype=jnp.float32)
    x2 = jax.random.normal(k2, (B, D), dtype=jnp.float32)

    # Parameters in native PyTorch layouts.
    w_emb = jax.random.normal(k3, (E, D), dtype=jnp.float32) * (1.0 / D ** 0.5)
    b_emb = jax.random.normal(k4, (E,), dtype=jnp.float32) * 0.01
    w_clf = jax.random.normal(k5, (1, E), dtype=jnp.float32) * (1.0 / E ** 0.5)
    b_clf = jax.random.normal(k6, (1,), dtype=jnp.float32) * 0.01

    out = contrastive_rp_net(x1, x2, w_emb, b_emb, w_clf, b_clf)
    out = jax.block_until_ready(out)

    # Full-precision reference for comparison.
    with jax.default_matmul_precision("highest"):
        ref = reference(x1, x2, w_emb, b_emb, w_clf, b_clf)

    assert out.shape == (B, 1)
    # f32 MXU operands (no bf16 pre-cast): typical observed error is <<1e-3; the
    # tolerance is left slack only to stay robust if a generation's default f32
    # matmul path uses reduced-precision MXU passes.
    assert jnp.allclose(out, ref, atol=5e-2, rtol=1e-2), float(jnp.max(jnp.abs(out - ref)))

    print("KERNEL_OK")
</pallas_src>

<mosaic_0001>
module attributes {stable_mosaic.version = 11 : i64} {
  func.func @contrastive_rp_kernel(%arg0: i32, %arg1: memref<512x128xf32, #tpu.memory_space<vmem>>, %arg2: memref<512x128xf32, #tpu.memory_space<vmem>>, %arg3: memref<128x128xf32, #tpu.memory_space<vmem>>, %arg4: memref<128x1xf32, #tpu.memory_space<vmem>>, %arg5: memref<1x1xf32, #tpu.memory_space<smem>>, %arg6: memref<1x512xf32, #tpu.memory_space<vmem>>) attributes {dimension_semantics = [#tpu.dimension_semantics<parallel>], iteration_bounds = array<i64: 2>, scalar_prefetch = 0 : i64, scratch_operands = 0 : i64, tpu.core_type = #tpu.core_type<tc>, window_params = [{transform_indices = @transform_0, window_bounds = array<i64: 512, 128>}, {transform_indices = @transform_1, window_bounds = array<i64: 512, 128>}, {pipeline_mode = #tpu.pipeline_mode<synchronous>, transform_indices = @transform_2, window_bounds = array<i64: 128, 128>}, {pipeline_mode = #tpu.pipeline_mode<synchronous>, transform_indices = @transform_3, window_bounds = array<i64: 128, 1>}, {transform_indices = @transform_4, window_bounds = array<i64: 1, 1>}, {transform_indices = @transform_5, window_bounds = array<i64: 1, 512>}]} {
    %c0 = arith.constant 0 : index
    %c0_0 = arith.constant 0 : index
    %0 = vector.load %arg1[%c0, %c0_0] : memref<512x128xf32, #tpu.memory_space<vmem>>, vector<512x128xf32>
    %c0_1 = arith.constant 0 : index
    %c0_2 = arith.constant 0 : index
    %1 = vector.load %arg2[%c0_1, %c0_2] : memref<512x128xf32, #tpu.memory_space<vmem>>, vector<512x128xf32>
    %2 = arith.subf %0, %1 : vector<512x128xf32>
    %c0_3 = arith.constant 0 : index
    %c0_4 = arith.constant 0 : index
    %3 = vector.load %arg3[%c0_3, %c0_4] : memref<128x128xf32, #tpu.memory_space<vmem>>, vector<128x128xf32>
    %cst = arith.constant dense<0.000000e+00> : vector<128x512xf32>
    %4 = tpu.matmul %3, %2, %cst {dimension_numbers = #tpu.dot_dimension_numbers<[1], [1], [0], [0], [0, 0, 1, 0], [], []>} : vector<128x128xf32>, vector<512x128xf32>, vector<128x512xf32> -> vector<128x512xf32>
    %5 = math.absf %4 : vector<128x512xf32>
    %c0_5 = arith.constant 0 : index
    %c0_6 = arith.constant 0 : index
    %6 = vector.load %arg4[%c0_5, %c0_6] : memref<128x1xf32, #tpu.memory_space<vmem>>, vector<128x1xf32>
    %7 = vector.broadcast %6 : vector<128x1xf32> to vector<128x512xf32>
    %8 = arith.mulf %5, %7 : vector<128x512xf32>
    %cst_7 = arith.constant dense<0.000000e+00> : vector<512xf32>
    %9 = vector.multi_reduction <add>, %8, %cst_7 [0] : vector<128x512xf32> to vector<512xf32>
    %10 = vector.shape_cast %9 : vector<512xf32> to vector<1x512xf32>
    %c0_8 = arith.constant 0 : index
    %c0_9 = arith.constant 0 : index
    %11 = memref.load %arg5[%c0_8, %c0_9] : memref<1x1xf32, #tpu.memory_space<smem>>
    %12 = vector.broadcast %11 : f32 to vector<1x512xf32>
    %13 = arith.addf %10, %12 : vector<1x512xf32>
    %c0_10 = arith.constant 0 : index
    %c0_11 = arith.constant 0 : index
    %14 = vector.load %arg6[%c0_10, %c0_11] : memref<1x512xf32, #tpu.memory_space<vmem>>, vector<1x512xf32>
    tpu.vector_store %arg6[%c0_10, %c0_11], %13 {strides = array<i32>} : memref<1x512xf32, #tpu.memory_space<vmem>>, vector<1x512xf32>,
    return
  }
  func.func @transform_0(%arg0: i32) -> (i32, i32) {
    %c0_i32 = arith.constant 0 : i32
    %c0_i32_0 = arith.constant 0 : i32
    return %arg0, %c0_i32 : i32, i32
  }
  func.func @transform_1(%arg0: i32) -> (i32, i32) {
    %c0_i32 = arith.constant 0 : i32
    %c0_i32_0 = arith.constant 0 : i32
    return %arg0, %c0_i32 : i32, i32
  }
  func.func @transform_2(%arg0: i32) -> (i32, i32) {
    %c0_i32 = arith.constant 0 : i32
    %c0_i32_0 = arith.constant 0 : i32
    %c0_i32_1 = arith.constant 0 : i32
    return %c0_i32, %c0_i32_0 : i32, i32
  }
  func.func @transform_3(%arg0: i32) -> (i32, i32) {
    %c0_i32 = arith.constant 0 : i32
    %c0_i32_0 = arith.constant 0 : i32
    %c0_i32_1 = arith.constant 0 : i32
    return %c0_i32, %c0_i32_0 : i32, i32
  }
  func.func @transform_4(%arg0: i32) -> (i32, i32) {
    %c0_i32 = arith.constant 0 : i32
    %c0_i32_0 = arith.constant 0 : i32
    %c0_i32_1 = arith.constant 0 : i32
    return %c0_i32, %c0_i32_0 : i32, i32
  }
  func.func @transform_5(%arg0: i32) -> (i32, i32) {
    %c0_i32 = arith.constant 0 : i32
    %c0_i32_0 = arith.constant 0 : i32
    return %c0_i32, %arg0 : i32, i32
  }
}

</mosaic_0001>

<bundles_post_ra>
// kernel: contrastive_rp_net.1
= control target key start
LH: loop header
LB: loop body
LE: loop exit
PB: predicated region body
PF: predicated region fallthrough
CT: control target
= control target key end

     0   :  { %s2171_s0 = inlined_call_operand.hbm [shape: f32[1024,128], index: 0, kind: input, shape index: {}]   ;;  %s2172_s1 = inlined_call_operand.hbm [shape: f32[1024,128], index: 1, kind: input, shape index: {}]   ;;  %s2173_s2 = inlined_call_operand.vmem [shape: f32[128,128], index: 2, kind: input, shape index: {}]   ;;  %s2174_s3 = inlined_call_operand.vmem [shape: f32[128,1], index: 3, kind: input, shape index: {}]   ;;  %s2175_s4 = inlined_call_operand.<no memory space> [shape: f32[1,1], index: 4, kind: input, shape index: {}]   ;;  %s2176_s5 = inlined_call_operand.hbm [shape: f32[1,1024], index: 5, kind: output, shape index: {}]  }
   0x1   :  { %10 = sst [smem:[#allocation2]] %s2175_s4 }
   0x2   :  { %11 = vsyncpa [#allocation4], 0 }
   0x3   :  { %13 = vsyncpa [#allocation4 + $0x1], 0 }
   0x4   :  { %14 = vsyncpa [#allocation7], 0 }
   0x5   :  { %16 = vsyncpa [#allocation7 + $0x1], 0 }
   0x6   :  { %17 = vsyncpa [#allocation5], 0 }
   0x7   :  { %19 = vsyncpa [#allocation5 + $0x1], 0  ;;  %s1715_s20 = smov 0   ;;  %s1717_s21 = smov 0  }
   0x8   :  { %s1719_s22 = smov 0   ;;  %s1721_s23 = smov 0  }
   0x9 LB: > { %s1736_s4 = sadd.s32 4294967295, %s1673_s23   ;;  %s1273_s24 = sadd.s32 4294967294, %s1673_s23   ;;  %s1673_s23 = sphi %s1721_s23, %s2192_s23   ;;  %s1669_s22 = sphi %s1719_s22, %s2191_s22   ;;  %s1665_s21 = sphi %s1717_s21, %s2190_s21   ;;  %s1661_s20 = sphi %s1715_s20, %s2189_s20  }
   0xa   : > { %s1740_s25 = sadd.s32 1, %s1673_s23   ;;  %s32_s26 = sadd.s32 1, %s1669_s22 }
   0xb   : > { %s29_s27 = ssub.s32 %s1673_s23, %s1740_s25  ;;  %p39_p0 = scmp.ne.s32.totalorder %s1669_s22, %s1665_s21 }
   0xc   : > { %p30_p1 = scmp.eq.s32.totalorder %s29_s27, 0  ;;  %p40_p2 = scmp.eq.s32.totalorder %s1673_s23, 0 }
   0xd   : > { %p45_p3 = scmp.ne.s32.totalorder %s1665_s21, %s1661_s20  ;;  %p46_p4 = scmp.eq.s32.totalorder %s1736_s4, 0 }
   0xe   : > { %s1752_s28 = scalar_select %p30_p1, %s1669_s22, %s32_s26  }
   0xf   : > { %p1754_p5 = por %p40_p2, %p39_p0  ;;  %p1758_p6 = por %p46_p4, %p45_p3 }
  0x10   : > { %p158_p7 = scmp.eq.s32.totalorder %s1736_s4, 1  ;;  %p164_p8 = scmp.eq.s32.totalorder %s1273_s24, 1 }
  0x11   : > { %s2180_s30 = scalar_select %p1758_p6, 1, 0 }
  0x12   : > { %p1503_p10 = scmp.lt.s32.totalorder %s1673_s23, 2  ;;  %p1765_p11 = por %p158_p7, %p39_p0 }
  0x13   : > { %p1769_p12 = por %p164_p8, %p45_p3  ;;  %s1774_s8 = sand.u32 1, %s1669_s22  }
  0x14   : > { %s2181_s6 = scalar_select %p1765_p11, 1, 0 }
  0x15   : > { %s2182_s7 = scalar_select %p1769_p12, 1, 0 }
  0x16   : > { %s1291_s9 = sshll.u32 %s1673_s23, 13  ;;  %s1276_s10 = sshll.u32 %s1774_s8, 9 }
  0x17   : > { %s1783_s13 = scalar_lea.hbm %s2171_s0, %s1291_s9  ;;  %s197_s14 = scalar_lea.vmem [#allocation3], %s1276_s10 }
  0x18   : > { %s204_s15 = sshll.u32 %s197_s14, 4  ;;  %p1789_p13 = pnand %p1503_p10, %p1754_p5  ;;  %s1793_s15 = int_to_ptr.vmem [resolvable:$true] %s204_s15 }
  0x19   : > { %s194_s17 = scalar_lea.sflag [#allocation4], %s1774_s8  ;;  %s1543_s18 = scalar_lea.hbm %s1783_s13, 8192 }
  0x1a   : > { %p1544_p0 = scmp.ne.s32.totalorder %s1783_s13, %s1543_s18  ;;  %p1545_p1 = pneg %p1789_p13 }
  0x1b   : > { %s1548_s26 = scalar_lea.hbm %s2171_s0, 16384  ;;  %p1549_p4 = scmp.lt.u32.totalorder %s1783_s13, %s2171_s0 }
  0x1c   : > { %p1546_p2 = pnand %p1545_p1, %p1544_p0  ;;  %p1550_p5 = scmp.lt.u32.totalorder %s1548_s26, %s1543_s18 }
  0x1d   : > { %p1552_p8 = scmp.lt.u32.totalorder %s1543_s18, %s1783_s13 }
  0x1e   : > { %p1547_p3 = pneg %p1546_p2  ;;  %p1551_p7 = por %p1550_p5, %p1549_p4 }
  0x20   : > { %p1553_p10 = por %p1552_p8, %p1551_p7 }
  0x22   : > { %p1554_p9 = pnand %p1553_p10, %p1547_p3 }
  0x24   : > { %1557 = shalt.err (!%p1554_p9)
}
  0x25   : > { %s1558_s11 = scalar_lea.vmem %s1793_s15, 8192  ;;  %s1675_s12 = smov [#allocation3]  }
  0x26   : > { %p1559_p0 = scmp.ne.s32.totalorder %s1793_s15, %s1558_s11  ;;  %s1563_s14 = sshll.u32 %s1675_s12, 4  ;;  %s1564_s14 = int_to_ptr.vmem [resolvable:$false] %s1563_s14 }
  0x27   : > { %s1565_s19 = scalar_lea.vmem %s1564_s14, 16384  ;;  %p1566_p11 = scmp.lt.s32.totalorder %s1793_s15, %s1564_s14 }
  0x28   : > { %p1561_p2 = pnand %p1559_p0, %p1545_p1  ;;  %p1567_p4 = scmp.lt.s32.totalorder %s1565_s19, %s1558_s11 }
  0x2a   : > { %p1562_p12 = pneg %p1561_p2  ;;  %p1568_p5 = por %p1567_p4, %p1566_p11 }
  0x2c   : > { %p1569_p7 = pnand %p1568_p5, %p1562_p12 }
  0x2e   : > { %1572 = shalt.err (!%p1569_p7)
}
  0x2f   : > { %s1676_s18 = smov 128   ;;  %s1677_s24 = smov 8  }
  0x30   : > { %1495 = dma.hbm_to_vmem [thread:$0]  (!%p1789_p13), %s1783_s13, 8192, %s1793_s15, %s194_s17, %s1676_s18, %s1676_s18, %s1677_s24  }
  0x31   : > { %p1282_p9 = scmp.ge.s32.totalorder %s1673_s23, 1  ;;  %p233_p11 = scmp.lt.s32.totalorder %s1673_s23, 3 }
  0x32   : > { %s1837_s11 = scalar_lea.hbm %s2172_s1, %s1291_s9  ;;  %s218_s12 = scalar_lea.vmem [#allocation6], %s1276_s10 }
  0x33   : > { %p1828_p12 = pnand %p1282_p9, %p233_p11  ;;  %s225_s14 = sshll.u32 %s218_s12, 4  ;;  %s1841_s14 = int_to_ptr.vmem [resolvable:$true] %s225_s14 }
  0x34   : > { %s215_s13 = scalar_lea.sflag [#allocation7], %s1774_s8  ;;  %s1573_s15 = scalar_lea.hbm %s1837_s11, 8192 }
  0x35   : > { %p1574_p3 = scmp.ne.s32.totalorder %s1837_s11, %s1573_s15  ;;  %s1578_s9 = scalar_lea.hbm %s2172_s1, 16384 }
  0x36   : > { %p1579_p0 = scmp.lt.u32.totalorder %s1837_s11, %s2172_s1  ;;  %p1580_p2 = scmp.lt.u32.totalorder %s1578_s9, %s1573_s15 }
  0x37   : > { %p1576_p8 = pnand %p1574_p3, %p1545_p1  ;;  %p1582_p5 = scmp.lt.u32.totalorder %s1573_s15, %s1837_s11 }
  0x38   : > { %p1581_p4 = por %p1580_p2, %p1579_p0 }
  0x39   : > { %p1577_p10 = pneg %p1576_p8 }
  0x3a   : > { %p1583_p7 = por %p1582_p5, %p1581_p4 }
  0x3c   : > { %p1584_p9 = pnand %p1583_p7, %p1577_p10 }
  0x3e   : > { %1587 = shalt.err (!%p1584_p9)
}
  0x3f   : > { %s1588_s10 = scalar_lea.vmem %s1841_s14, 8192  ;;  %s1678_s12 = smov [#allocation6]  }
  0x40   : > { %p1589_p11 = scmp.ne.s32.totalorder %s1841_s14, %s1588_s10  ;;  %s1593_s17 = sshll.u32 %s1678_s12, 4  ;;  %s1594_s17 = int_to_ptr.vmem [resolvable:$false] %s1593_s17 }
  0x41   : > { %s1595_s19 = scalar_lea.vmem %s1594_s17, 16384  ;;  %p1596_p6 = scmp.lt.s32.totalorder %s1841_s14, %s1594_s17 }
  0x42   : > { %p1591_p3 = pnand %p1589_p11, %p1545_p1  ;;  %p1597_p0 = scmp.lt.s32.totalorder %s1595_s19, %s1588_s10 }
  0x44   : > { %p1592_p8 = pneg %p1591_p3  ;;  %p1598_p2 = por %p1597_p0, %p1596_p6 }
  0x46   : > { %p1599_p4 = pnand %p1598_p2, %p1592_p8 }
  0x48   : > { %1602 = shalt.err (!%p1599_p4)
}
  0x49   : > { %1498 = dma.hbm_to_vmem [thread:$0]  (!%p1789_p13), %s1837_s11, 8192, %s1841_s14, %s215_s13, %s1676_s18, %s1676_s18, %s1677_s24  }
  0x4a   : > { %237 = sbr.rel (%p1828_p12) target bundleno = 474 (0x1da), region = 40  ;;  %s1875_s15 = sand.u32 (!%p1828_p12), 1, %s1665_s21  }
  0x4b   : > { %s1283_s9 = sshll.u32 (!%p1828_p12), %s1875_s15, 9  ;;  %s240_s27 = scalar_lea.sflag (!%p1828_p12), [#allocation4], %s1875_s15 }
  0x4c   : > { %s1879_s16 = scalar_lea.vmem (!%p1828_p12), [#allocation3], %s1283_s9  ;;  %p2185_p6 = scmp.ne.s32.totalorder (!%p1828_p12), %s2180_s30, 0 }
  0x51   : > { %1648 = dma.done.wait (%p2185_p6), %s240_s27, 8192  }
  0x52   : > { %1650 = vsyncadd (%p2185_p6), %s240_s27, 4294959104  ;;  %s249_s8 = scalar_lea.sflag [#allocation7], %s1875_s15  ;;  %s1886_s18 = scalar_lea.vmem [#allocation6], %s1283_s9 }
  0x53   : > { %1652 = dma.done.wait (%p2185_p6), %s249_s8, 8192  }
  0x54   : > { %1654 = vsyncadd (%p2185_p6), %s249_s8, 4294959104  ;;  %v303_v0 = vld [vmem:[%s1879_s16 + $0x80] sm:$0xff]  ;;  %v304_v1 = vld [vmem:[%s1879_s16 + $0x88] sm:$0xff]  ;;  %v1679_v32 = vmov 0   ;;  %s1125_s24 = sld [smem:[#allocation2]]  ;;  %s1293_s26 = sshll.u32 %s1736_s4, 6 }
  0x55   : > { %v367_v2 = vld [vmem:[%s1886_s18 + $0x80] sm:$0xff]  ;;  %v368_v3 = vld [vmem:[%s1886_s18 + $0x88] sm:$0xff]  ;;  %v305_v25 = vld [vmem:[%s1879_s16 + $0x90] sm:$0xff]  ;;  %1541 = vset.pattern.permute.xlu0 %v1679_v32  ;;  %1542 = vset.pattern.permute.xlu1 %v1679_v32  ;;  %s2127_s10 = scalar_lea.hbm %s2176_s5, %s1293_s26  ;;  %s1166_s12 = scalar_lea.sflag [#allocation5], %s1875_s15 }
  0x56   : > { %v431_v4 = vsub.f32 %v303_v0, %v367_v2  ;;  %v335_v5 = vld [vmem:[%s1879_s16 + $0x180] sm:$0xff]  ;;  %v336_v6 = vld [vmem:[%s1879_s16 + $0x188] sm:$0xff]  ;;  %v432_v7 = vsub.f32 %v304_v1, %v368_v3  ;;  %v306_v26 = vld [vmem:[%s1879_s16 + $0x98] sm:$0xff]  ;;  %p2186_p1 = scmp.ne.s32.totalorder %s2181_s6, 0  ;;  %s1681_s4 = smov [#allocation8]  }
  0x57   : > { %v399_v8 = vld [vmem:[%s1886_s18 + $0x180] sm:$0xff]  ;;  %v400_v9 = vld [vmem:[%s1886_s18 + $0x188] sm:$0xff]  ;;  %v369_v29 = vld [vmem:[%s1886_s18 + $0x90] sm:$0xff]  ;;  %s1607_s19 = sshll.u32 %s1681_s4, 4  ;;  %s1608_s19 = int_to_ptr.vmem [resolvable:$false] %s1607_s19 }
  0x58   : > { %v287_v10 = vld [vmem:[%s1879_s16] sm:$0xff]  ;;  %v463_v11 = vsub.f32 %v335_v5, %v399_v8  ;;  %v464_v12 = vsub.f32 %v336_v6, %v400_v9  ;;  %v288_v13 = vld [vmem:[%s1879_s16 + $0x8] sm:$0xff]  ;;  %v1422_v16 = vpack.c.bf16 %v432_v7, %v431_v4  ;;  %v370_v30 = vld [vmem:[%s1886_s18 + $0x98] sm:$0xff]  ;;  %v433_v33 = vsub.f32 %v305_v25, %v369_v29  ;;  %s1609_s9 = scalar_lea.vmem %s1608_s19, 128 }
  0x59   : > { %v351_v14 = vld [vmem:[%s1886_s18] sm:$0xff]  ;;  %v352_v15 = vld [vmem:[%s1886_s18 + $0x8] sm:$0xff]  ;;  %v337_v31 = vld [vmem:[%s1879_s16 + $0x190] sm:$0xff]  ;;  %v434_v34 = vsub.f32 %v306_v26, %v370_v30 }
  0x5a   : > { %v415_v17 = vsub.f32 %v287_v10, %v351_v14  ;;  %v416_v18 = vsub.f32 %v288_v13, %v352_v15  ;;  %v319_v19 = vld [vmem:[%s1879_s16 + $0x100] sm:$0xff]  ;;  %v320_v20 = vld [vmem:[%s1879_s16 + $0x108] sm:$0xff]  ;;  %v1454_v22 = vpack.c.bf16 %v464_v12, %v463_v11  ;;  %1423 = vmatprep.subr.bf16.mxu0 %v1422_v16  ;;  %v338_v35 = vld [vmem:[%s1879_s16 + $0x198] sm:$0xff] }
  0x5b   : > { %v383_v21 = vld [vmem:[%s1886_s18 + $0x100] sm:$0xff]  ;;  %v384_v23 = vld [vmem:[%s1886_s18 + $0x108] sm:$0xff]  ;;  %v401_v36 = vld [vmem:[%s1886_s18 + $0x190] sm:$0xff]  ;;  %v1426_v44 = vpack.c.bf16 %v434_v34, %v433_v33 }
  0x5c   : > { %v447_v24 = vsub.f32 %v319_v19, %v383_v21  ;;  %v1424_v27 = vpack.c.bf16 %v416_v18, %v415_v17  ;;  %v448_v28 = vsub.f32 %v320_v20, %v384_v23  ;;  %1455 = vmatprep.subr.bf16.mxu1 %v1454_v22  ;;  %v402_v37 = vld [vmem:[%s1886_s18 + $0x198] sm:$0xff]  ;;  %v465_v39 = vsub.f32 %v337_v31, %v401_v36  ;;  %v289_v41 = vld [vmem:[%s1879_s16 + $0x10] sm:$0xff]  ;;  %v307_v53 = vld [vmem:[%s1879_s16 + $0xa0] sm:$0xff] }
  0x5d   : > { %v466_v40 = vsub.f32 %v338_v35, %v402_v37  ;;  %v290_v42 = vld [vmem:[%s1879_s16 + $0x18] sm:$0xff]  ;;  %v353_v43 = vld [vmem:[%s1886_s18 + $0x10] sm:$0xff]  ;;  %v308_v56 = vld [vmem:[%s1879_s16 + $0xa8] sm:$0xff] }
  0x5e   : > { %1425 = vmatpush3.bf16.xpose.msra.mxu0 %v1424_v27  ;;  %v1456_v38 = vpack.c.bf16 %v448_v28, %v447_v24  ;;  %v354_v45 = vld [vmem:[%s1886_s18 + $0x18] sm:$0xff]  ;;  %v417_v46 = vsub.f32 %v289_v41, %v353_v43  ;;  %v321_v47 = vld [vmem:[%s1879_s16 + $0x110] sm:$0xff]  ;;  %v371_v57 = vld [vmem:[%s1886_s18 + $0xa0] sm:$0xff] }
  0x5f   : > { %v322_v48 = vld [vmem:[%s1879_s16 + $0x118] sm:$0xff]  ;;  %v1458_v49 = vpack.c.bf16 %v466_v40, %v465_v39  ;;  %v418_v50 = vsub.f32 %v290_v42, %v354_v45  ;;  %v385_v51 = vld [vmem:[%s1886_s18 + $0x110] sm:$0xff]  ;;  %1427 = vmatprep.subr.bf16.mxu0 %v1426_v44  ;;  %v372_v58 = vld [vmem:[%s1886_s18 + $0xa8] sm:$0xff]  ;;  %v435_v60 = vsub.f32 %v307_v53, %v371_v57 }
  0x60   : > { %1457 = vmatpush3.bf16.xpose.msra.mxu1 %v1456_v38  ;;  %v386_v52 = vld [vmem:[%s1886_s18 + $0x118] sm:$0xff]  ;;  %v449_v54 = vsub.f32 %v321_v47, %v385_v51  ;;  %v436_v61 = vsub.f32 %v308_v56, %v372_v58  ;;  %v339_v62 = vld [vmem:[%s1879_s16 + $0x1a0] sm:$0xff]  ;;  %v340_v63 = vld [vmem:[%s1879_s16 + $0x1a8] sm:$0xff] }
  0x61   : > { %v450_v55 = vsub.f32 %v322_v48, %v386_v52  ;;  %1459 = vmatprep.subr.bf16.mxu1 %v1458_v49  ;;  %v1428_v59 = vpack.c.bf16 %v418_v50, %v417_v46  ;;  %v403_v0 = vld [vmem:[%s1886_s18 + $0x1a0] sm:$0xff]  ;;  %v404_v1 = vld [vmem:[%s1886_s18 + $0x1a8] sm:$0xff]  ;;  %v309_v17 = vld [vmem:[%s1879_s16 + $0xb0] sm:$0xff] }
  0x62   : > { %v467_v2 = vsub.f32 %v339_v62, %v403_v0  ;;  %v291_v3 = vld [vmem:[%s1879_s16 + $0x20] sm:$0xff]  ;;  %v292_v4 = vld [vmem:[%s1879_s16 + $0x28] sm:$0xff]  ;;  %v1430_v6 = vpack.c.bf16 %v436_v61, %v435_v60  ;;  %v468_v7 = vsub.f32 %v340_v63, %v404_v1  ;;  %v310_v18 = vld [vmem:[%s1879_s16 + $0xb8] sm:$0xff] }
  0x63   : > { %v1460_v5 = vpack.c.bf16 %v450_v55, %v449_v54  ;;  %v355_v8 = vld [vmem:[%s1886_s18 + $0x20] sm:$0xff]  ;;  %v356_v9 = vld [vmem:[%s1886_s18 + $0x28] sm:$0xff]  ;;  %v373_v19 = vld [vmem:[%s1886_s18 + $0xb0] sm:$0xff] }
  0x64   : > { %v323_v10 = vld [vmem:[%s1879_s16 + $0x120] sm:$0xff]  ;;  %v324_v11 = vld [vmem:[%s1879_s16 + $0x128] sm:$0xff]  ;;  %v1462_v14 = vpack.c.bf16 %v468_v7, %v467_v2  ;;  %v419_v15 = vsub.f32 %v291_v3, %v355_v8  ;;  %v420_v16 = vsub.f32 %v292_v4, %v356_v9  ;;  %v374_v20 = vld [vmem:[%s1886_s18 + $0xb8] sm:$0xff]  ;;  %v437_v21 = vsub.f32 %v309_v17, %v373_v19 }
  0x65   : > { %v387_v12 = vld [vmem:[%s1886_s18 + $0x120] sm:$0xff]  ;;  %v388_v13 = vld [vmem:[%s1886_s18 + $0x128] sm:$0xff]  ;;  %v341_v22 = vld [vmem:[%s1879_s16 + $0x1b0] sm:$0xff]  ;;  %v438_v26 = vsub.f32 %v310_v18, %v374_v20 }
  0x66   : > { %1429 = vmatpush3.bf16.xpose.msra.mxu0 %v1428_v59  ;;  %v342_v23 = vld [vmem:[%s1879_s16 + $0x1b8] sm:$0xff]  ;;  %v451_v24 = vsub.f32 %v323_v10, %v387_v12  ;;  %v452_v25 = vsub.f32 %v324_v11, %v388_v13  ;;  %v405_v27 = vld [vmem:[%s1886_s18 + $0x1b0] sm:$0xff]  ;;  %v1432_v32 = vpack.c.bf16 %v420_v16, %v419_v15  ;;  %v311_v39 = vld [vmem:[%s1879_s16 + $0xc0] sm:$0xff] }
  0x67   : > { %1431 = vmatprep.subr.bf16.mxu0 %v1430_v6  ;;  %v406_v28 = vld [vmem:[%s1886_s18 + $0x1b8] sm:$0xff]  ;;  %v469_v29 = vsub.f32 %v341_v22, %v405_v27  ;;  %v293_v31 = vld [vmem:[%s1879_s16 + $0x30] sm:$0xff]  ;;  %v1434_v36 = vpack.c.bf16 %v438_v26, %v437_v21  ;;  %v312_v41 = vld [vmem:[%s1879_s16 + $0xc8] sm:$0xff] }
  0x68   : > { %1461 = vmatpush3.bf16.xpose.msra.mxu1 %v1460_v5  ;;  %v470_v30 = vsub.f32 %v342_v23, %v406_v28  ;;  %v294_v33 = vld [vmem:[%s1879_s16 + $0x38] sm:$0xff]  ;;  %v357_v34 = vld [vmem:[%s1886_s18 + $0x30] sm:$0xff]  ;;  %v1464_v40 = vpack.c.bf16 %v452_v25, %v451_v24  ;;  %v375_v42 = vld [vmem:[%s1886_s18 + $0xc0] sm:$0xff] }
  0x69   : > { %1463 = vmatprep.subr.bf16.mxu1 %v1462_v14  ;;  %v358_v35 = vld [vmem:[%s1886_s18 + $0x38] sm:$0xff]  ;;  %v325_v37 = vld [vmem:[%s1879_s16 + $0x130] sm:$0xff]  ;;  %v376_v43 = vld [vmem:[%s1886_s18 + $0xc8] sm:$0xff]  ;;  %v421_v48 = vsub.f32 %v293_v31, %v357_v34  ;;  %v439_v53 = vsub.f32 %v311_v39, %v375_v42 }
  0x6a   : > { %v326_v38 = vld [vmem:[%s1879_s16 + $0x138] sm:$0xff]  ;;  %v1466_v44 = vpack.c.bf16 %v470_v30, %v469_v29  ;;  %v389_v45 = vld [vmem:[%s1886_s18 + $0x130] sm:$0xff]  ;;  %v343_v47 = vld [vmem:[%s1879_s16 + $0x1c0] sm:$0xff]  ;;  %v422_v49 = vsub.f32 %v294_v33, %v358_v35  ;;  %v440_v54 = vsub.f32 %v312_v41, %v376_v43 }
  0x6b   : > { %v390_v46 = vld [vmem:[%s1886_s18 + $0x138] sm:$0xff]  ;;  %v344_v50 = vld [vmem:[%s1879_s16 + $0x1c8] sm:$0xff]  ;;  %v407_v51 = vld [vmem:[%s1886_s18 + $0x1c0] sm:$0xff]  ;;  %v453_v55 = vsub.f32 %v325_v37, %v389_v45 }
  0x6c   : > { %v408_v52 = vld [vmem:[%s1886_s18 + $0x1c8] sm:$0xff]  ;;  %v454_v56 = vsub.f32 %v326_v38, %v390_v46  ;;  %v471_v57 = vsub.f32 %v343_v47, %v407_v51  ;;  %v295_v59 = vld [vmem:[%s1879_s16 + $0x40] sm:$0xff]  ;;  %v1436_v60 = vpack.c.bf16 %v422_v49, %v421_v48  ;;  %v1438_v0 = vpack.c.bf16 %v440_v54, %v439_v53  ;;  %v313_v3 = vld [vmem:[%s1879_s16 + $0xd0] sm:$0xff] }
  0x6d   : > { %v472_v58 = vsub.f32 %v344_v50, %v408_v52  ;;  %v296_v61 = vld [vmem:[%s1879_s16 + $0x48] sm:$0xff]  ;;  %v359_v62 = vld [vmem:[%s1886_s18 + $0x40] sm:$0xff]  ;;  %v314_v5 = vld [vmem:[%s1879_s16 + $0xd8] sm:$0xff] }
  0x6e   : > { %1433 = vmatpush3.bf16.xpose.msra.mxu0 %v1432_v32  ;;  %v360_v63 = vld [vmem:[%s1886_s18 + $0x48] sm:$0xff]  ;;  %v327_v1 = vld [vmem:[%s1879_s16 + $0x140] sm:$0xff]  ;;  %v1468_v4 = vpack.c.bf16 %v454_v56, %v453_v55  ;;  %v377_v6 = vld [vmem:[%s1886_s18 + $0xd0] sm:$0xff]  ;;  %v423_v12 = vsub.f32 %v295_v59, %v359_v62 }
  0x6f   : > { %1435 = vmatprep.subr.bf16.mxu0 %v1434_v36  ;;  %v328_v2 = vld [vmem:[%s1879_s16 + $0x148] sm:$0xff]  ;;  %v378_v7 = vld [vmem:[%s1886_s18 + $0xd8] sm:$0xff]  ;;  %v1470_v8 = vpack.c.bf16 %v472_v58, %v471_v57  ;;  %v391_v9 = vld [vmem:[%s1886_s18 + $0x140] sm:$0xff]  ;;  %v424_v13 = vsub.f32 %v296_v61, %v360_v63  ;;  %v441_v17 = vsub.f32 %v313_v3, %v377_v6 }
  0x70   : > { %1465 = vmatpush3.bf16.xpose.msra.mxu1 %v1464_v40  ;;  %v392_v10 = vld [vmem:[%s1886_s18 + $0x148] sm:$0xff]  ;;  %v345_v11 = vld [vmem:[%s1879_s16 + $0x1d0] sm:$0xff]  ;;  %v346_v14 = vld [vmem:[%s1879_s16 + $0x1d8] sm:$0xff]  ;;  %v442_v18 = vsub.f32 %v314_v5, %v378_v7  ;;  %v455_v19 = vsub.f32 %v327_v1, %v391_v9 }
  0x71   : > { %1467 = vmatprep.subr.bf16.mxu1 %v1466_v44  ;;  %v409_v15 = vld [vmem:[%s1886_s18 + $0x1d0] sm:$0xff]  ;;  %v410_v16 = vld [vmem:[%s1886_s18 + $0x1d8] sm:$0xff]  ;;  %v456_v20 = vsub.f32 %v328_v2, %v392_v10  ;;  %v1440_v24 = vpack.c.bf16 %v424_v13, %v423_v12  ;;  %v315_v31 = vld [vmem:[%s1879_s16 + $0xe0] sm:$0xff] }
  0x72   : > { %v473_v21 = vsub.f32 %v345_v11, %v409_v15  ;;  %v474_v22 = vsub.f32 %v346_v14, %v410_v16  ;;  %v297_v23 = vld [vmem:[%s1879_s16 + $0x50] sm:$0xff]  ;;  %v298_v25 = vld [vmem:[%s1879_s16 + $0x58] sm:$0xff]  ;;  %v1442_v28 = vpack.c.bf16 %v442_v18, %v441_v17  ;;  %v316_v33 = vld [vmem:[%s1879_s16 + $0xe8] sm:$0xff] }
  0x73   : > { %v361_v26 = vld [vmem:[%s1886_s18 + $0x50] sm:$0xff]  ;;  %v362_v27 = vld [vmem:[%s1886_s18 + $0x58] sm:$0xff]  ;;  %v1472_v32 = vpack.c.bf16 %v456_v20, %v455_v19  ;;  %v379_v34 = vld [vmem:[%s1886_s18 + $0xe0] sm:$0xff] }
  0x74   : > { %v329_v29 = vld [vmem:[%s1879_s16 + $0x150] sm:$0xff]  ;;  %v330_v30 = vld [vmem:[%s1879_s16 + $0x158] sm:$0xff]  ;;  %v380_v35 = vld [vmem:[%s1886_s18 + $0xe8] sm:$0xff]  ;;  %v1474_v36 = vpack.c.bf16 %v474_v22, %v473_v21  ;;  %v425_v40 = vsub.f32 %v297_v23, %v361_v26  ;;  %v426_v41 = vsub.f32 %v298_v25, %v362_v27  ;;  %v443_v45 = vsub.f32 %v315_v31, %v379_v34 }
  0x75   : > { %v393_v37 = vld [vmem:[%s1886_s18 + $0x150] sm:$0xff]  ;;  %v394_v38 = vld [vmem:[%s1886_s18 + $0x158] sm:$0xff]  ;;  %v347_v39 = vld [vmem:[%s1879_s16 + $0x1e0] sm:$0xff]  ;;  %v444_v46 = vsub.f32 %v316_v33, %v380_v35 }
  0x76   : > { %1437 = vmatpush3.bf16.xpose.msra.mxu0 %v1436_v60  ;;  %v348_v42 = vld [vmem:[%s1879_s16 + $0x1e8] sm:$0xff]  ;;  %v411_v43 = vld [vmem:[%s1886_s18 + $0x1e0] sm:$0xff]  ;;  %v457_v47 = vsub.f32 %v329_v29, %v393_v37  ;;  %v458_v48 = vsub.f32 %v330_v30, %v394_v38  ;;  %v1444_v53 = vpack.c.bf16 %v426_v41, %v425_v40  ;;  %v317_v62 = vld [vmem:[%s1879_s16 + $0xf0] sm:$0xff] }
  0x77   : > { %1439 = vmatprep.subr.bf16.mxu0 %v1438_v0  ;;  %v412_v44 = vld [vmem:[%s1886_s18 + $0x1e8] sm:$0xff]  ;;  %v1999_v49 = vld [vmem:[%s2173_s2] sm:$0xff]  ;;  %v475_v50 = vsub.f32 %v347_v39, %v411_v43  ;;  %v1446_v57 = vpack.c.bf16 %v444_v46, %v443_v45  ;;  %v318_v0 = vld [vmem:[%s1879_s16 + $0xf8] sm:$0xff] }
  0x78   : > { %1469 = vmatpush3.bf16.xpose.msra.mxu1 %v1468_v4  ;;  %v476_v51 = vsub.f32 %v348_v42, %v412_v44  ;;  %v299_v52 = vld [vmem:[%s1879_s16 + $0x60] sm:$0xff]  ;;  %1326 = vmatprep.mubr.f32.mxu0 %v1999_v49  ;;  %v300_v54 = vld [vmem:[%s1879_s16 + $0x68] sm:$0xff]  ;;  %v1476_v63 = vpack.c.bf16 %v458_v48, %v457_v47  ;;  %v381_v1 = vld [vmem:[%s1886_s18 + $0xf0] sm:$0xff] }
  0x79   : > { %1471 = vmatprep.subr.bf16.mxu1 %v1470_v8  ;;  %v363_v55 = vld [vmem:[%s1886_s18 + $0x60] sm:$0xff]  ;;  %v364_v56 = vld [vmem:[%s1886_s18 + $0x68] sm:$0xff]  ;;  %1390 = vmatprep.mubr.f32.mxu1 %v1999_v49  ;;  %v382_v2 = vld [vmem:[%s1886_s18 + $0xf8] sm:$0xff]  ;;  %v445_v12 = vsub.f32 %v317_v62, %v381_v1 }
  0x7a   : > { %v331_v58 = vld [vmem:[%s1879_s16 + $0x160] sm:$0xff]  ;;  %v332_v59 = vld [vmem:[%s1879_s16 + $0x168] sm:$0xff]  ;;  %v1478_v3 = vpack.c.bf16 %v476_v51, %v475_v50  ;;  %v349_v4 = vld [vmem:[%s1879_s16 + $0x1f0] sm:$0xff]  ;;  %v427_v7 = vsub.f32 %v299_v52, %v363_v55  ;;  %v428_v8 = vsub.f32 %v300_v54, %v364_v56  ;;  %v446_v13 = vsub.f32 %v318_v0, %v382_v2 }
  0x7b   : > { %v395_v60 = vld [vmem:[%s1886_s18 + $0x160] sm:$0xff]  ;;  %v396_v61 = vld [vmem:[%s1886_s18 + $0x168] sm:$0xff]  ;;  %v350_v5 = vld [vmem:[%s1879_s16 + $0x1f8] sm:$0xff] }
  0x7c   : > { %v413_v6 = vld [vmem:[%s1886_s18 + $0x1f0] sm:$0xff]  ;;  %v414_v9 = vld [vmem:[%s1886_s18 + $0x1f8] sm:$0xff]  ;;  %v881_v10 = vld [vmem:[%s2174_s3] sm:$0xff]  ;;  %v459_v14 = vsub.f32 %v331_v58, %v395_v60  ;;  %v460_v15 = vsub.f32 %v332_v59, %v396_v61  ;;  %v1448_v20 = vpack.c.bf16 %v428_v8, %v427_v7  ;;  %v1450_v22 = vpack.c.bf16 %v446_v13, %v445_v12 }
  0x7d   : > { %v883_v11 = vld [vmem:[%s2174_s3 + $0x10] sm:$0xff]  ;;  %899 = vperm.xlu0 %1541, %v881_v10   ;;  %v882_v16 = vld [vmem:[%s2174_s3 + $0x8] sm:$0xff]  ;;  %v477_v17 = vsub.f32 %v349_v4, %v413_v6  ;;  %v478_v18 = vsub.f32 %v350_v5, %v414_v9  ;;  %v884_v19 = vld [vmem:[%s2174_s3 + $0x18] sm:$0xff] }
  0x7e   : > { %1441 = vmatpush3.bf16.xpose.msra.mxu0 %v1440_v24  ;;  %909 = vperm.xlu1 %1542, %v883_v11   ;;  %v301_v21 = vld [vmem:[%s1879_s16 + $0x70] sm:$0xff]  ;;  %v302_v23 = vld [vmem:[%s1879_s16 + $0x78] sm:$0xff]  ;;  %v1480_v26 = vpack.c.bf16 %v460_v15, %v459_v14  ;;  %v885_v29 = vld [vmem:[%s2174_s3 + $0x20] sm:$0xff] }
  0x7f   : > { %1443 = vmatprep.subr.bf16.mxu0 %v1442_v28  ;;  %v365_v24 = vld [vmem:[%s1886_s18 + $0x70] sm:$0xff]  ;;  %v366_v25 = vld [vmem:[%s1886_s18 + $0x78] sm:$0xff]  ;;  %v1482_v30 = vpack.c.bf16 %v478_v18, %v477_v17  ;;  %v886_v33 = vld [vmem:[%s2174_s3 + $0x28] sm:$0xff] }
  0x80   : > { %1473 = vmatpush3.bf16.xpose.msra.mxu1 %v1472_v32  ;;  %v333_v27 = vld [vmem:[%s1879_s16 + $0x170] sm:$0xff]  ;;  %v334_v28 = vld [vmem:[%s1879_s16 + $0x178] sm:$0xff]  ;;  %v429_v34 = vsub.f32 %v301_v21, %v365_v24  ;;  %v430_v35 = vsub.f32 %v302_v23, %v366_v25  ;;  %v889_v42 = vld [vmem:[%s2174_s3 + $0x40] sm:$0xff] }
  0x81   : > { %1475 = vmatprep.subr.bf16.mxu1 %v1474_v36  ;;  %904 = vperm.xlu0 %1541, %v882_v16   ;;  %v397_v31 = vld [vmem:[%s1886_s18 + $0x170] sm:$0xff]  ;;  %v398_v32 = vld [vmem:[%s1886_s18 + $0x178] sm:$0xff]  ;;  %v890_v43 = vld [vmem:[%s2174_s3 + $0x48] sm:$0xff]  ;;  %s1285_s18 = sshll.u32 %s1875_s15, 2 }
  0x82   : > { %914 = vperm.xlu1 %1542, %v884_v19   ;;  %v461_v36 = vsub.f32 %v333_v27, %v397_v31  ;;  %v462_v37 = vsub.f32 %v334_v28, %v398_v32  ;;  %v887_v38 = vld [vmem:[%s2174_s3 + $0x30] sm:$0xff]  ;;  %v888_v39 = vld [vmem:[%s2174_s3 + $0x38] sm:$0xff]  ;;  %v1452_v40 = vpack.c.bf16 %v430_v35, %v429_v34  ;;  %v480_v46 = vld [vmem:[%s2173_s2 + $0x8] sm:$0xff]  ;;  %s283_s11 = scalar_lea.vmem [#allocation8], %s1285_s18 }
  0x83   : > { %v891_v44 = vld [vmem:[%s2174_s3 + $0x50] sm:$0xff]  ;;  %v892_v45 = vld [vmem:[%s2174_s3 + $0x58] sm:$0xff]  ;;  %v893_v47 = vld [vmem:[%s2174_s3 + $0x60] sm:$0xff]  ;;  %s1180_s14 = sshll.u32 %s283_s11, 4  ;;  %s2129_s14 = int_to_ptr.vmem [resolvable:$true] %s1180_s14 }
  0x84   : > { %v1484_v41 = vpack.c.bf16 %v462_v37, %v461_v36  ;;  %v894_v48 = vld [vmem:[%s2174_s3 + $0x68] sm:$0xff]  ;;  %v481_v50 = vld [vmem:[%s2173_s2 + $0x10] sm:$0xff]  ;;  %v896_v52 = vld [vmem:[%s2174_s3 + $0x78] sm:$0xff]  ;;  %s1603_s17 = scalar_lea.vmem %s2129_s14, 64  ;;  %p1610_p5 = scmp.lt.s32.totalorder %s2129_s14, %s1608_s19 }
  0x85   : > { %919 = vperm.xlu0 %1541, %v885_v29   ;;  %v895_v51 = vld [vmem:[%s2174_s3 + $0x70] sm:$0xff]  ;;  %v484_v54 = vld [vmem:[%s2173_s2 + $0x28] sm:$0xff]  ;;  %v486_v56 = vld [vmem:[%s2173_s2 + $0x38] sm:$0xff]  ;;  %p1604_p13 = scmp.ne.s32.totalorder %s2129_s14, %s1603_s17  ;;  %p1611_p7 = scmp.lt.s32.totalorder %s1609_s9, %s1603_s17 }
  0x86   : > { %1445 = vmatpush3.bf16.xpose.msra.mxu0 %v1444_v53  ;;  %924 = vperm.xlu1 %1542, %v886_v33   ;;  %v483_v53 = vld [vmem:[%s2173_s2 + $0x20] sm:$0xff]  ;;  %v485_v55 = vld [vmem:[%s2173_s2 + $0x30] sm:$0xff]  ;;  %v488_v58 = vld [vmem:[%s2173_s2 + $0x48] sm:$0xff] }
  0x87   : > { %1447 = vmatprep.subr.bf16.mxu0 %v1446_v57  ;;  %v487_v57 = vld [vmem:[%s2173_s2 + $0x40] sm:$0xff]  ;;  %v489_v59 = vld [vmem:[%s2173_s2 + $0x50] sm:$0xff]  ;;  %v490_v60 = vld [vmem:[%s2173_s2 + $0x58] sm:$0xff]  ;;  %p1605_p12 = pnand %p1604_p13, %p2186_p1  ;;  %p1612_p9 = por %p1611_p7, %p1610_p5 }
  0x88   : > { %1477 = vmatpush3.bf16.xpose.msra.mxu1 %v1476_v63  ;;  %v491_v61 = vld [vmem:[%s2173_s2 + $0x60] sm:$0xff]  ;;  %v492_v62 = vld [vmem:[%s2173_s2 + $0x68] sm:$0xff]  ;;  %v493_v63 = vld [vmem:[%s2173_s2 + $0x70] sm:$0xff] }
  0x89   : > { %1479 = vmatprep.subr.bf16.mxu1 %v1478_v3  ;;  %929 = vperm.xlu0 %1541, %v887_v38   ;;  %v494_v0 = vld [vmem:[%s2173_s2 + $0x78] sm:$0xff]  ;;  %p1606_p10 = pneg %p1605_p12 }
  0x8a   : > { %934 = vperm.xlu1 %1542, %v888_v39  }
  0x8b   : > { %p1613_p11 = pnand %p1612_p9, %p1606_p10 }
  0x8d   : > { %939 = vperm.xlu0 %1541, %v889_v42  }
  0x8e   : > { %1449 = vmatpush3.bf16.xpose.msra.mxu0 %v1448_v20  ;;  %944 = vperm.xlu1 %1542, %v890_v43  }
  0x8f   : > { %1451 = vmatprep.subr.bf16.mxu0 %v1450_v22 }
  0x90   : > { %1481 = vmatpush3.bf16.xpose.msra.mxu1 %v1480_v26 }
  0x91   : > { %1483 = vmatprep.subr.bf16.mxu1 %v1482_v30  ;;  %949 = vperm.xlu0 %1541, %v891_v44  }
  0x92   : > { %954 = vperm.xlu1 %1542, %v892_v45  }
  0x95   : > { %959 = vperm.xlu0 %1541, %v893_v47  }
  0x96   : > { %1453 = vmatpush3.bf16.xpose.msra.mxu0 %v1452_v40  ;;  %964 = vperm.xlu1 %1542, %v894_v48  }
  0x98   : > { %1485 = vmatpush3.bf16.xpose.msra.mxu1 %v1484_v41 }
  0x99   : > { %969 = vperm.xlu0 %1541, %v895_v51  }
  0x9a   : > { %974 = vperm.xlu1 %1542, %v896_v52  }
  0x9d   : > { %1327 = vmatmul.mubr.f32.vlgmr.msra.gmra.mrb[0].mxu0 %v1999_v49 }
  0x9e   : > { %1328 = vmatprep.mubr.f32.mxu0 %v480_v46 }
  0x9f   : > { %1391 = vmatmul.mubr.f32.vlgmr.msra.gmra.mrb[0].mxu1 %v1999_v49  ;;  %v482_v49 = vld [vmem:[%s2173_s2 + $0x18] sm:$0xff] }
  0xa0   : > { %1392 = vmatprep.mubr.f32.mxu1 %v480_v46 }
  0xa1   : > { %1329 = vmatmul.mubr.f32.gmra.mrb[2].mxu0 %v480_v46 }
  0xa2   : > { %1330 = vmatprep.mubr.f32.mxu0 %v481_v50 }
  0xa3   : > { %1393 = vmatmul.mubr.f32.gmra.mrb[2].mxu1 %v480_v46 }
  0xa4   : > { %1394 = vmatprep.mubr.f32.mxu1 %v481_v50 }
  0xa5   : > { %1331 = vmatmul.mubr.f32.gmra.mrb[4].mxu0 %v481_v50 }
  0xa6   : > { %1332 = vmatprep.mubr.f32.mxu0 %v482_v49 }
  0xa7   : > { %1395 = vmatmul.mubr.f32.gmra.mrb[4].mxu1 %v481_v50 }
  0xa8   : > { %1396 = vmatprep.mubr.f32.mxu1 %v482_v49 }
  0xa9   : > { %1333 = vmatmul.mubr.f32.gmra.mrb[6].mxu0 %v482_v49 }
  0xaa   : > { %1334 = vmatprep.mubr.f32.mxu0 %v483_v53 }
  0xab   : > { %1397 = vmatmul.mubr.f32.gmra.mrb[6].mxu1 %v482_v49 }
  0xac   : > { %1398 = vmatprep.mubr.f32.mxu1 %v483_v53 }
  0xad   : > { %1335 = vmatmul.mubr.f32.gmra.mrb[8].mxu0 %v483_v53 }
  0xae   : > { %1336 = vmatprep.mubr.f32.mxu0 %v484_v54 }
  0xaf   : > { %1399 = vmatmul.mubr.f32.gmra.mrb[8].mxu1 %v483_v53 }
  0xb0   : > { %1400 = vmatprep.mubr.f32.mxu1 %v484_v54 }
  0xb1   : > { %1337 = vmatmul.mubr.f32.gmra.mrb[10].mxu0 %v484_v54 }
  0xb2   : > { %1338 = vmatprep.mubr.f32.mxu0 %v485_v55 }
  0xb3   : > { %1401 = vmatmul.mubr.f32.gmra.mrb[10].mxu1 %v484_v54 }
  0xb4   : > { %1402 = vmatprep.mubr.f32.mxu1 %v485_v55 }
  0xb5   : > { %1339 = vmatmul.mubr.f32.gmra.mrb[12].mxu0 %v485_v55 }
  0xb6   : > { %1340 = vmatprep.mubr.f32.mxu0 %v486_v56 }
  0xb7   : > { %1403 = vmatmul.mubr.f32.gmra.mrb[12].mxu1 %v485_v55 }
  0xb8   : > { %1404 = vmatprep.mubr.f32.mxu1 %v486_v56 }
  0xb9   : > { %1341 = vmatmul.mubr.f32.gmra.mrb[14].mxu0 %v486_v56 }
  0xba   : > { %1342 = vmatprep.mubr.f32.mxu0 %v487_v57 }
  0xbb   : > { %1405 = vmatmul.mubr.f32.gmra.mrb[14].mxu1 %v486_v56 }
  0xbc   : > { %1406 = vmatprep.mubr.f32.mxu1 %v487_v57 }
  0xbd   : > { %1343 = vmatmul.mubr.f32.gmra.mrb[16].mxu0 %v487_v57 }
  0xbe   : > { %1344 = vmatprep.mubr.f32.mxu0 %v488_v58 }
  0xbf   : > { %1407 = vmatmul.mubr.f32.gmra.mrb[16].mxu1 %v487_v57 }
  0xc0   : > { %1408 = vmatprep.mubr.f32.mxu1 %v488_v58 }
  0xc1   : > { %1345 = vmatmul.mubr.f32.gmra.mrb[18].mxu0 %v488_v58 }
  0xc2   : > { %1346 = vmatprep.mubr.f32.mxu0 %v489_v59 }
  0xc3   : > { %1409 = vmatmul.mubr.f32.gmra.mrb[18].mxu1 %v488_v58 }
  0xc4   : > { %1410 = vmatprep.mubr.f32.mxu1 %v489_v59 }
  0xc5   : > { %1347 = vmatmul.mubr.f32.gmra.mrb[20].mxu0 %v489_v59 }
  0xc6   : > { %1348 = vmatprep.mubr.f32.mxu0 %v490_v60 }
  0xc7   : > { %1411 = vmatmul.mubr.f32.gmra.mrb[20].mxu1 %v489_v59 }
  0xc8   : > { %1412 = vmatprep.mubr.f32.mxu1 %v490_v60 }
  0xc9   : > { %1349 = vmatmul.mubr.f32.gmra.mrb[22].mxu0 %v490_v60 }
  0xca   : > { %1350 = vmatprep.mubr.f32.mxu0 %v491_v61 }
  0xcb   : > { %1413 = vmatmul.mubr.f32.gmra.mrb[22].mxu1 %v490_v60 }
  0xcc   : > { %1414 = vmatprep.mubr.f32.mxu1 %v491_v61 }
  0xcd   : > { %1351 = vmatmul.mubr.f32.gmra.mrb[24].mxu0 %v491_v61 }
  0xce   : > { %1352 = vmatprep.mubr.f32.mxu0 %v492_v62 }
  0xcf   : > { %1415 = vmatmul.mubr.f32.gmra.mrb[24].mxu1 %v491_v61 }
  0xd0   : > { %1416 = vmatprep.mubr.f32.mxu1 %v492_v62 }
  0xd1   : > { %1353 = vmatmul.mubr.f32.gmra.mrb[26].mxu0 %v492_v62 }
  0xd2   : > { %1354 = vmatprep.mubr.f32.mxu0 %v493_v63 }
  0xd3   : > { %1417 = vmatmul.mubr.f32.gmra.mrb[26].mxu1 %v492_v62 }
  0xd4   : > { %1418 = vmatprep.mubr.f32.mxu1 %v493_v63 }
  0xd5   : > { %1355 = vmatmul.mubr.f32.gmra.mrb[28].mxu0 %v493_v63 }
  0xd6   : > { %1356 = vmatprep.mubr.f32.mxu0 %v494_v0 }
  0xd7   : > { %1419 = vmatmul.mubr.f32.gmra.mrb[28].mxu1 %v493_v63 }
  0xd8   : > { %1420 = vmatprep.mubr.f32.mxu1 %v494_v0 }
  0xd9   : > { %1357 = vmatmul.mubr.f32.gmra.mrb[30].mxu0 %v494_v0 }
  0xdb   : > { %1421 = vmatmul.mubr.f32.gmra.mrb[30].mxu1 %v494_v0 }
  0xfc   : > { %v900_v1 = vpop.permute.xlu0 %899 }
  0xfd   : > { %v910_v23 = vpop.permute.xlu1 %909 }
 0x100   : > { %v905_v9 = vpop.permute.xlu0 %904 }
 0x101   : > { %v915_v50 = vpop.permute.xlu1 %914 }
 0x104   : > { %v920_v0 = vpop.permute.xlu0 %919 }
 0x170   : > { %v561_v2 = vpop.f32.mrb[0].mxu0 }
 0x171   : > { %v563_v3 = vpop.f32.mrb[1].mxu0  ;;  %v817_v5 = vand.u32 2147483647, %v561_v2 }
 0x172   : > { %v722_v4 = vpop.f32.mrb[0].mxu1  ;;  %v818_v7 = vand.u32 2147483647, %v563_v3 }
 0x173   : > { %v724_v6 = vpop.f32.mrb[1].mxu1  ;;  %v819_v10 = vand.u32 2147483647, %v722_v4  ;;  %v977_v16 = vmul.f32 %v900_v1, %v817_v5 }
 0x174   : > { %v567_v8 = vpop.f32.mrb[2].mxu0  ;;  %v820_v13 = vand.u32 2147483647, %v724_v6  ;;  %v978_v20 = vmul.f32 %v900_v1, %v818_v7 }
 0x175   : > { %v821_v11 = vand.u32 2147483647, %v567_v8  ;;  %v569_v12 = vpop.f32.mrb[3].mxu0  ;;  %v979_v25 = vmul.f32 %v900_v1, %v819_v10 }
 0x176   : > { %v728_v14 = vpop.f32.mrb[2].mxu1  ;;  %v822_v15 = vand.u32 2147483647, %v569_v12  ;;  %v980_v30 = vmul.f32 %v900_v1, %v820_v13 }
 0x177   : > { %v823_v17 = vand.u32 2147483647, %v728_v14  ;;  %v730_v18 = vpop.f32.mrb[3].mxu1  ;;  %v981_v19 = vmul.f32 %v905_v9, %v821_v11 }
 0x178   : > { %v824_v21 = vand.u32 2147483647, %v730_v18  ;;  %v982_v22 = vmul.f32 %v905_v9, %v822_v15  ;;  %v573_v24 = vpop.f32.mrb[4].mxu0 }
 0x179   : > { %v983_v26 = vmul.f32 %v905_v9, %v823_v17  ;;  %v825_v27 = vand.u32 2147483647, %v573_v24  ;;  %v1041_v28 = vadd.f32 %v981_v19, %v977_v16  ;;  %v575_v29 = vpop.f32.mrb[5].mxu0  ;;  %v925_v17 = vpop.permute.xlu1 %924 }
 0x17a   : > { %v984_v31 = vmul.f32 %v905_v9, %v824_v21  ;;  %v734_v32 = vpop.f32.mrb[4].mxu1  ;;  %v826_v33 = vand.u32 2147483647, %v575_v29  ;;  %v1062_v34 = vadd.f32 %v982_v22, %v978_v20 }
 0x17b   : > { %v985_v35 = vmul.f32 %v910_v23, %v825_v27  ;;  %v827_v36 = vand.u32 2147483647, %v734_v32  ;;  %v1083_v37 = vadd.f32 %v983_v26, %v979_v25  ;;  %v736_v38 = vpop.f32.mrb[5].mxu1 }
 0x17c   : > { %v986_v39 = vmul.f32 %v910_v23, %v826_v33  ;;  %v828_v40 = vand.u32 2147483647, %v736_v38  ;;  %v1104_v41 = vadd.f32 %v984_v31, %v980_v30  ;;  %v579_v42 = vpop.f32.mrb[6].mxu0 }
 0x17d   : > { %v1042_v43 = vadd.f32 %v1041_v28, %v985_v35  ;;  %v987_v44 = vmul.f32 %v910_v23, %v827_v36  ;;  %v829_v45 = vand.u32 2147483647, %v579_v42  ;;  %v581_v46 = vpop.f32.mrb[7].mxu0 }
 0x17e   : > { %v1063_v47 = vadd.f32 %v1062_v34, %v986_v39  ;;  %v988_v48 = vmul.f32 %v910_v23, %v828_v40  ;;  %v740_v51 = vpop.f32.mrb[6].mxu1  ;;  %v830_v52 = vand.u32 2147483647, %v581_v46  ;;  %v930_v34 = vpop.permute.xlu0 %929 }
 0x17f   : > { %v1084_v49 = vadd.f32 %v1083_v37, %v987_v44  ;;  %v989_v53 = vmul.f32 %v915_v50, %v829_v45  ;;  %v831_v54 = vand.u32 2147483647, %v740_v51  ;;  %v742_v55 = vpop.f32.mrb[7].mxu1 }
 0x180   : > { %v1105_v56 = vadd.f32 %v1104_v41, %v988_v48  ;;  %v990_v57 = vmul.f32 %v915_v50, %v830_v52  ;;  %v832_v58 = vand.u32 2147483647, %v742_v55  ;;  %v585_v59 = vpop.f32.mrb[8].mxu0  ;;  %v935_v52 = vpop.permute.xlu1 %934 }
 0x181   : > { %v1043_v60 = vadd.f32 %v1042_v43, %v989_v53  ;;  %v991_v61 = vmul.f32 %v915_v50, %v831_v54  ;;  %v833_v62 = vand.u32 2147483647, %v585_v59  ;;  %v587_v63 = vpop.f32.mrb[9].mxu0 }
 0x182   : > { %v1064_v1 = vadd.f32 %v1063_v47, %v990_v57  ;;  %v992_v2 = vmul.f32 %v915_v50, %v832_v58  ;;  %v746_v3 = vpop.f32.mrb[8].mxu1  ;;  %v834_v4 = vand.u32 2147483647, %v587_v63 }
 0x183   : > { %v1085_v5 = vadd.f32 %v1084_v49, %v991_v61  ;;  %v993_v6 = vmul.f32 %v920_v0, %v833_v62  ;;  %v835_v7 = vand.u32 2147483647, %v746_v3  ;;  %v748_v8 = vpop.f32.mrb[9].mxu1 }
 0x184   : > { %v1106_v9 = vadd.f32 %v1105_v56, %v992_v2  ;;  %v994_v10 = vmul.f32 %v920_v0, %v834_v4  ;;  %v836_v11 = vand.u32 2147483647, %v748_v8  ;;  %v591_v12 = vpop.f32.mrb[10].mxu0  ;;  %v940_v4 = vpop.permute.xlu0 %939 }
 0x185   : > { %v1044_v13 = vadd.f32 %v1043_v60, %v993_v6  ;;  %v995_v14 = vmul.f32 %v920_v0, %v835_v7  ;;  %v837_v15 = vand.u32 2147483647, %v591_v12  ;;  %v593_v16 = vpop.f32.mrb[11].mxu0 }
 0x186   : > { %v1065_v18 = vadd.f32 %v1064_v1, %v994_v10  ;;  %v996_v19 = vmul.f32 %v920_v0, %v836_v11  ;;  %v752_v20 = vpop.f32.mrb[10].mxu1  ;;  %v838_v21 = vand.u32 2147483647, %v593_v16 }
 0x187   : > { %v1086_v22 = vadd.f32 %v1085_v5, %v995_v14  ;;  %v997_v23 = vmul.f32 %v925_v17, %v837_v15  ;;  %v839_v24 = vand.u32 2147483647, %v752_v20  ;;  %v754_v25 = vpop.f32.mrb[11].mxu1 }
 0x188   : > { %v1107_v26 = vadd.f32 %v1106_v9, %v996_v19  ;;  %v998_v27 = vmul.f32 %v925_v17, %v838_v21  ;;  %v840_v28 = vand.u32 2147483647, %v754_v25  ;;  %v597_v29 = vpop.f32.mrb[12].mxu0  ;;  %v945_v21 = vpop.permute.xlu1 %944 }
 0x189   : > { %v1045_v30 = vadd.f32 %v1044_v13, %v997_v23  ;;  %v999_v31 = vmul.f32 %v925_v17, %v839_v24  ;;  %v841_v32 = vand.u32 2147483647, %v597_v29  ;;  %v599_v33 = vpop.f32.mrb[13].mxu0 }
 0x18a   : > { %v1066_v35 = vadd.f32 %v1065_v18, %v998_v27  ;;  %v1000_v36 = vmul.f32 %v925_v17, %v840_v28  ;;  %v758_v37 = vpop.f32.mrb[12].mxu1  ;;  %v842_v38 = vand.u32 2147483647, %v599_v33 }
 0x18b   : > { %v1087_v39 = vadd.f32 %v1086_v22, %v999_v31  ;;  %v1001_v40 = vmul.f32 %v930_v34, %v841_v32  ;;  %v843_v41 = vand.u32 2147483647, %v758_v37  ;;  %v760_v42 = vpop.f32.mrb[13].mxu1 }
 0x18c   : > { %v1108_v43 = vadd.f32 %v1107_v26, %v1000_v36  ;;  %v1002_v44 = vmul.f32 %v930_v34, %v842_v38  ;;  %v844_v45 = vand.u32 2147483647, %v760_v42  ;;  %v603_v46 = vpop.f32.mrb[14].mxu0  ;;  %v950_v38 = vpop.permute.xlu0 %949 }
 0x18d   : > { %v1046_v47 = vadd.f32 %v1045_v30, %v1001_v40  ;;  %v1003_v48 = vmul.f32 %v930_v34, %v843_v41  ;;  %v845_v50 = vand.u32 2147483647, %v603_v46  ;;  %v605_v51 = vpop.f32.mrb[15].mxu0 }
 0x18e   : > { %v1067_v49 = vadd.f32 %v1066_v35, %v1002_v44  ;;  %v1004_v53 = vmul.f32 %v930_v34, %v844_v45  ;;  %v764_v54 = vpop.f32.mrb[14].mxu1  ;;  %v846_v55 = vand.u32 2147483647, %v605_v51 }
 0x18f   : > { %v1088_v56 = vadd.f32 %v1087_v39, %v1003_v48  ;;  %v1005_v57 = vmul.f32 %v935_v52, %v845_v50  ;;  %v847_v58 = vand.u32 2147483647, %v764_v54  ;;  %v766_v59 = vpop.f32.mrb[15].mxu1 }
 0x190   : > { %v1109_v60 = vadd.f32 %v1108_v43, %v1004_v53  ;;  %v1006_v61 = vmul.f32 %v935_v52, %v846_v55  ;;  %v848_v62 = vand.u32 2147483647, %v766_v59  ;;  %v609_v63 = vpop.f32.mrb[16].mxu0  ;;  %v955_v55 = vpop.permute.xlu1 %954 }
 0x191   : > { %v1047_v0 = vadd.f32 %v1046_v47, %v1005_v57  ;;  %v1007_v1 = vmul.f32 %v935_v52, %v847_v58  ;;  %v849_v2 = vand.u32 2147483647, %v609_v63  ;;  %v611_v3 = vpop.f32.mrb[17].mxu0 }
 0x192   : > { %v1068_v5 = vadd.f32 %v1067_v49, %v1006_v61  ;;  %v1008_v6 = vmul.f32 %v935_v52, %v848_v62  ;;  %v770_v7 = vpop.f32.mrb[16].mxu1  ;;  %v850_v8 = vand.u32 2147483647, %v611_v3 }
 0x193   : > { %v1089_v9 = vadd.f32 %v1088_v56, %v1007_v1  ;;  %v1009_v10 = vmul.f32 %v940_v4, %v849_v2  ;;  %v851_v11 = vand.u32 2147483647, %v770_v7  ;;  %v772_v12 = vpop.f32.mrb[17].mxu1 }
 0x194   : > { %v1110_v13 = vadd.f32 %v1109_v60, %v1008_v6  ;;  %v1010_v14 = vmul.f32 %v940_v4, %v850_v8  ;;  %v852_v15 = vand.u32 2147483647, %v772_v12  ;;  %v615_v16 = vpop.f32.mrb[18].mxu0  ;;  %v960_v8 = vpop.permute.xlu0 %959 }
 0x195   : > { %v1048_v17 = vadd.f32 %v1047_v0, %v1009_v10  ;;  %v1011_v18 = vmul.f32 %v940_v4, %v851_v11  ;;  %v853_v19 = vand.u32 2147483647, %v615_v16  ;;  %v617_v20 = vpop.f32.mrb[19].mxu0 }
 0x196   : > { %v1069_v22 = vadd.f32 %v1068_v5, %v1010_v14  ;;  %v1012_v23 = vmul.f32 %v940_v4, %v852_v15  ;;  %v776_v24 = vpop.f32.mrb[18].mxu1  ;;  %v854_v25 = vand.u32 2147483647, %v617_v20 }
 0x197   : > { %v1090_v26 = vadd.f32 %v1089_v9, %v1011_v18  ;;  %v1013_v27 = vmul.f32 %v945_v21, %v853_v19  ;;  %v855_v28 = vand.u32 2147483647, %v776_v24  ;;  %v778_v29 = vpop.f32.mrb[19].mxu1 }
 0x198   : > { %v1111_v30 = vadd.f32 %v1110_v13, %v1012_v23  ;;  %v1014_v31 = vmul.f32 %v945_v21, %v854_v25  ;;  %v856_v32 = vand.u32 2147483647, %v778_v29  ;;  %v621_v33 = vpop.f32.mrb[20].mxu0  ;;  %v965_v25 = vpop.permute.xlu1 %964 }
 0x199   : > { %v1049_v34 = vadd.f32 %v1048_v17, %v1013_v27  ;;  %v1015_v35 = vmul.f32 %v945_v21, %v855_v28  ;;  %v857_v36 = vand.u32 2147483647, %v621_v33  ;;  %v623_v37 = vpop.f32.mrb[21].mxu0 }
 0x19a   : > { %v1070_v39 = vadd.f32 %v1069_v22, %v1014_v31  ;;  %v1016_v40 = vmul.f32 %v945_v21, %v856_v32  ;;  %v782_v41 = vpop.f32.mrb[20].mxu1  ;;  %v858_v42 = vand.u32 2147483647, %v623_v37 }
 0x19b   : > { %v1091_v43 = vadd.f32 %v1090_v26, %v1015_v35  ;;  %v1017_v44 = vmul.f32 %v950_v38, %v857_v36  ;;  %v859_v45 = vand.u32 2147483647, %v782_v41  ;;  %v784_v46 = vpop.f32.mrb[21].mxu1 }
 0x19c   : > { %v1112_v47 = vadd.f32 %v1111_v30, %v1016_v40  ;;  %v1018_v48 = vmul.f32 %v950_v38, %v858_v42  ;;  %v860_v50 = vand.u32 2147483647, %v784_v46  ;;  %v627_v51 = vpop.f32.mrb[22].mxu0  ;;  %v970_v42 = vpop.permute.xlu0 %969 }
 0x19d   : > { %v1050_v52 = vadd.f32 %v1049_v34, %v1017_v44  ;;  %v1019_v49 = vmul.f32 %v950_v38, %v859_v45  ;;  %v861_v53 = vand.u32 2147483647, %v627_v51  ;;  %v629_v54 = vpop.f32.mrb[23].mxu0 }
 0x19e   : > { %v1071_v56 = vadd.f32 %v1070_v39, %v1018_v48  ;;  %v1020_v57 = vmul.f32 %v950_v38, %v860_v50  ;;  %v788_v58 = vpop.f32.mrb[22].mxu1  ;;  %v862_v59 = vand.u32 2147483647, %v629_v54 }
 0x19f   : > { %v1092_v60 = vadd.f32 %v1091_v43, %v1019_v49  ;;  %v1021_v61 = vmul.f32 %v955_v55, %v861_v53  ;;  %v863_v62 = vand.u32 2147483647, %v788_v58  ;;  %v790_v63 = vpop.f32.mrb[23].mxu1 }
 0x1a0   : > { %v1113_v0 = vadd.f32 %v1112_v47, %v1020_v57  ;;  %v1022_v1 = vmul.f32 %v955_v55, %v862_v59  ;;  %v864_v2 = vand.u32 2147483647, %v790_v63  ;;  %v633_v3 = vpop.f32.mrb[24].mxu0  ;;  %v975_v59 = vpop.permute.xlu1 %974 }
 0x1a1   : > { %v1051_v4 = vadd.f32 %v1050_v52, %v1021_v61  ;;  %v1023_v5 = vmul.f32 %v955_v55, %v863_v62  ;;  %v865_v6 = vand.u32 2147483647, %v633_v3  ;;  %v635_v7 = vpop.f32.mrb[25].mxu0 }
 0x1a2   : > { %v1072_v9 = vadd.f32 %v1071_v56, %v1022_v1  ;;  %v1024_v10 = vmul.f32 %v955_v55, %v864_v2  ;;  %v794_v11 = vpop.f32.mrb[24].mxu1  ;;  %v866_v12 = vand.u32 2147483647, %v635_v7 }
 0x1a3   : > { %v1093_v13 = vadd.f32 %v1092_v60, %v1023_v5  ;;  %v1025_v14 = vmul.f32 %v960_v8, %v865_v6  ;;  %v867_v15 = vand.u32 2147483647, %v794_v11  ;;  %v796_v16 = vpop.f32.mrb[25].mxu1 }
 0x1a4   : > { %v1114_v17 = vadd.f32 %v1113_v0, %v1024_v10  ;;  %v1026_v18 = vmul.f32 %v960_v8, %v866_v12  ;;  %v868_v19 = vand.u32 2147483647, %v796_v16  ;;  %v639_v20 = vpop.f32.mrb[26].mxu0 }
 0x1a5   : > { %v1052_v21 = vadd.f32 %v1051_v4, %v1025_v14  ;;  %v1027_v22 = vmul.f32 %v960_v8, %v867_v15  ;;  %v869_v23 = vand.u32 2147483647, %v639_v20  ;;  %v641_v24 = vpop.f32.mrb[27].mxu0 }
 0x1a6   : > { %v1073_v26 = vadd.f32 %v1072_v9, %v1026_v18  ;;  %v1028_v27 = vmul.f32 %v960_v8, %v868_v19  ;;  %v800_v28 = vpop.f32.mrb[26].mxu1  ;;  %v870_v29 = vand.u32 2147483647, %v641_v24 }
 0x1a7   : > { %v1094_v30 = vadd.f32 %v1093_v13, %v1027_v22  ;;  %v1029_v31 = vmul.f32 %v965_v25, %v869_v23  ;;  %v871_v32 = vand.u32 2147483647, %v800_v28  ;;  %v802_v33 = vpop.f32.mrb[27].mxu1  ;;  %v1680_v23 = vmov 1966171168  }
 0x1a8   : > { %v1115_v34 = vadd.f32 %v1114_v17, %v1028_v27  ;;  %v1030_v35 = vmul.f32 %v965_v25, %v870_v29  ;;  %v872_v36 = vand.u32 2147483647, %v802_v33  ;;  %v645_v37 = vpop.f32.mrb[28].mxu0  ;;  %v1138_v24 = vunpack.c.l.s4 %v1680_v23 }
 0x1a9   : > { %v1053_v38 = vadd.f32 %v1052_v21, %v1029_v31  ;;  %v1031_v39 = vmul.f32 %v965_v25, %v871_v32  ;;  %v873_v40 = vand.u32 2147483647, %v645_v37  ;;  %v647_v41 = vpop.f32.mrb[29].mxu0  ;;  %v1126_v31 = vstv %s1125_s24 }
 0x1aa   : > { %v1074_v43 = vadd.f32 %v1073_v26, %v1030_v35  ;;  %v1032_v44 = vmul.f32 %v965_v25, %v872_v36  ;;  %v806_v45 = vpop.f32.mrb[28].mxu1  ;;  %v874_v46 = vand.u32 2147483647, %v647_v41  ;;  %v1140_v25 = vlaneseq }
 0x1ab   : > { %v1095_v47 = vadd.f32 %v1094_v30, %v1031_v39  ;;  %v1033_v48 = vmul.f32 %v970_v42, %v873_v40  ;;  %v875_v50 = vand.u32 2147483647, %v806_v45  ;;  %v808_v51 = vpop.f32.mrb[29].mxu1  ;;  %v1139_v35 = vunpack.c.0.s8 %v1138_v24 }
 0x1ac   : > { %v1116_v52 = vadd.f32 %v1115_v34, %v1032_v44  ;;  %v1034_v49 = vmul.f32 %v970_v42, %v874_v46  ;;  %v876_v53 = vand.u32 2147483647, %v808_v51  ;;  %v651_v54 = vpop.f32.mrb[30].mxu0  ;;  %v1141_v36 = vshrl.u32 %v1140_v25, 7 }
 0x1ad   : > { %v1054_v55 = vadd.f32 %v1053_v38, %v1033_v48  ;;  %v1035_v56 = vmul.f32 %v970_v42, %v875_v50  ;;  %v877_v57 = vand.u32 2147483647, %v651_v54  ;;  %v653_v58 = vpop.f32.mrb[31].mxu0  ;;  %vm1162_vm0 = vcmp.lt.s32.totalorder %v1140_v25, 512 }
 0x1ae   : > { %v1075_v60 = vadd.f32 %v1074_v43, %v1034_v49  ;;  %v1036_v61 = vmul.f32 %v970_v42, %v876_v53  ;;  %v812_v62 = vpop.f32.mrb[30].mxu1  ;;  %v878_v63 = vand.u32 2147483647, %v653_v58  ;;  %v1142_v45 = vsub.s32 %v1139_v35, %v1141_v36 }
 0x1af   : > { %v1096_v0 = vadd.f32 %v1095_v47, %v1035_v56  ;;  %v1037_v1 = vmul.f32 %v975_v59, %v877_v57  ;;  %v879_v2 = vand.u32 2147483647, %v812_v62  ;;  %v814_v3 = vpop.f32.mrb[31].mxu1 }
 0x1b0   : > { %v1117_v4 = vadd.f32 %v1116_v52, %v1036_v61  ;;  %v1038_v5 = vmul.f32 %v975_v59, %v878_v63  ;;  %v880_v6 = vand.u32 2147483647, %v814_v3 }
 0x1b1   : > { %v1055_v7 = vadd.f32 %v1054_v55, %v1037_v1  ;;  %v1039_v8 = vmul.f32 %v975_v59, %v879_v2 }
 0x1b2   : > { %v1076_v9 = vadd.f32 %v1075_v60, %v1038_v5  ;;  %v1040_v10 = vmul.f32 %v975_v59, %v880_v6 }
 0x1b3   : > { %v1056_v11 = vrot.slane %v1055_v7, 4  ;;  %v1097_v12 = vadd.f32 %v1096_v0, %v1039_v8 }
 0x1b4   : > { %v1077_v13 = vrot.slane %v1076_v9, 4  ;;  %v1118_v14 = vadd.f32 %v1117_v4, %v1040_v10 }
 0x1b5   : > { %v1057_v15 = vadd.f32 %v1056_v11, %v1055_v7  ;;  %v1098_v16 = vrot.slane %v1097_v12, 4 }
 0x1b6   : > { %v1078_v17 = vadd.f32 %v1077_v13, %v1076_v9  ;;  %v1119_v18 = vrot.slane %v1118_v14, 4 }
 0x1b7   : > { %v1058_v19 = vrot.slane %v1057_v15, 2  ;;  %v1099_v20 = vadd.f32 %v1098_v16, %v1097_v12 }
 0x1b8   : > { %v1079_v21 = vrot.slane %v1078_v17, 2  ;;  %v1120_v22 = vadd.f32 %v1119_v18, %v1118_v14 }
 0x1b9   : > { %v1059_v26 = vadd.f32 %v1058_v19, %v1057_v15  ;;  %v1100_v27 = vrot.slane %v1099_v20, 2 }
 0x1ba   : > { %v1080_v28 = vadd.f32 %v1079_v21, %v1078_v17  ;;  %v1121_v29 = vrot.slane %v1120_v22, 2 }
 0x1bb   : > { %v1060_v30 = vrot.slane %v1059_v26, 1  ;;  %v1101_v32 = vadd.f32 %v1100_v27, %v1099_v20 }
 0x1bc   : > { %v1081_v33 = vrot.slane %v1080_v28, 1  ;;  %v1122_v34 = vadd.f32 %v1121_v29, %v1120_v22 }
 0x1bd   : > { %v1061_v37 = vadd.f32 %v1060_v30, %v1059_v26  ;;  %v1102_v38 = vrot.slane %v1101_v32, 1 }
 0x1be   : > { %v1082_v39 = vadd.f32 %v1081_v33, %v1080_v28  ;;  %v1123_v40 = vrot.slane %v1122_v34, 1 }
 0x1bf   : > { %v1127_v41 = vadd.f32 %v1126_v31, %v1061_v37  ;;  %v1103_v42 = vadd.f32 %v1102_v38, %v1101_v32 }
 0x1c0   : > { %v1128_v43 = vadd.f32 %v1126_v31, %v1082_v39  ;;  %v1124_v44 = vadd.f32 %v1123_v40, %v1122_v34 }
 0x1c1   : > { %v1129_v46 = vadd.f32 %v1126_v31, %v1103_v42 }
 0x1c2   : > { %v1135_v47 = vcombine.low %v1127_v41, %v1128_v43  ;;  %v1130_v48 = vadd.f32 %v1126_v31, %v1124_v44 }
 0x1c4   : > { %v1136_v50 = vcombine.low %v1129_v46, %v1130_v48  ;;  %v1143_v51 = vrot.slane %v1135_v47, %v1142_v45 }
 0x1c6   : > { %v1150_v52 = vrot.slane %v1136_v50, %v1142_v45 }
 0x1c8   : > { %v1151_v49 = vcombine.low %v1143_v51, %v1150_v52 }
 0x1ca   : > { %v1158_v53 = vrot.slane %v1151_v49, %v1142_v45 }
 0x1cc   : > { %1164 = vst.msk [vmem:[%s283_s11] sm:$0xf] %vm1162_vm0, %v1158_v53 }
 0x1cd   : > { %1616 = shalt.err (!%p1613_p11)
}
 0x1ce   : > { %s1617_s15 = scalar_lea.hbm %s2127_s10, 64  ;;  %s1621_s16 = scalar_lea.hbm %s2176_s5, 128 }
 0x1cf   : > { %p1618_p3 = scmp.ne.s32.totalorder %s2127_s10, %s1617_s15  ;;  %p1622_p2 = scmp.lt.u32.totalorder %s2127_s10, %s2176_s5 }
 0x1d0   : > { %p1623_p4 = scmp.lt.u32.totalorder %s1621_s16, %s1617_s15  ;;  %p1625_p13 = scmp.lt.u32.totalorder %s1617_s15, %s2127_s10 }
 0x1d1   : > { %p1619_p8 = pnand %p1618_p3, %p2186_p1 }
 0x1d2   : > { %p1624_p6 = por %p1623_p4, %p1622_p2 }
 0x1d3   : > { %p1620_p0 = pneg %p1619_p8 }
 0x1d4   : > { %p1626_p12 = por %p1625_p13, %p1624_p6 }
 0x1d6   : > { %p1627_p10 = pnand %p1626_p12, %p1620_p0 }
 0x1d8   : > { %1630 = shalt.err (!%p1627_p10)
}
 0x1d9   : > { %1490 = dma.vmem_to_hbm [thread:$0]  (%p2186_p1), %s2129_s14, 64, %s2127_s10, %s1166_s12  }
 0x1da PF: > { %s1192_s18 = sand.u32 1, %s1661_s20   ;;  %p2187_p5 = scmp.ne.s32.totalorder %s2182_s7, 0 }
 0x1db   : > { %p2188_p7 = scmp.ge.s32.totalorder %s1673_s23, 2  ;;  %s1193_s26 = scalar_lea.sflag [#allocation5], %s1192_s18 }
 0x1dd   : > { %p1500_p9 = pnand %p2188_p7, %p2187_p5 }
 0x1df   : > { %1656 = dma.done.wait (!%p1500_p9), %s1193_s26, 64  }
 0x1e0   : > { %1658 = vsyncadd (!%p1500_p9), %s1193_s26, 4294967232  ;;  %p22_p11 = scmp.ge.s32.totalorder %s1740_s25, 4   ;;  %s2189_s20 = smov %s1665_s21 }
 0x1e1   : > { %s2190_s21 = smov %s1669_s22  ;;  %s2191_s22 = smov %s1752_s28 }
 0x1e2   : > { %s2192_s23 = smov %s1740_s25  ;;  %24 = sbr.rel (!%p22_p11) target bundleno = 9 (0x9), region = 98 }
 0x1e9   :  { %1198 = vsyncpa [#allocation4], 1 }
 0x1ea   :  { %1200 = vsyncpa [#allocation4 + $0x1], 1 }
 0x1eb   :  { %1201 = vsyncpa [#allocation7], 1 }
 0x1ec   :  { %1203 = vsyncpa [#allocation7 + $0x1], 1 }
 0x1ed   :  { %1204 = vsyncpa [#allocation5], 1 }
 0x1ee   :  { %1206 = vsyncpa [#allocation5 + $0x1], 1 }

</bundles_post_ra>
